<compile_context>
chip_gen: v5e
topology: v5e:2x2
jax: 0.10.0
libtpu: 0.0.40
codegen_flags: <defaults>
</compile_context>

<pallas_src>
import math
from functools import partial

import jax
import jax.numpy as jnp
from jax.experimental import pallas as pl
from jax.experimental.pallas import tpu as pltpu


def _round_up(x: int, m: int) -> int:
    return ((x + m - 1) // m) * m


def _loss_kernel(x_ref, t_ref, o_ref, acc_ref, *, mode: str, b_true: int,
                 f_true: int, tb: int):
    """Lane-dense kernel body.

    x_ref/t_ref: (K, TB) tiles, batch on lanes.  acc_ref: (n_acc, 1) VMEM
    accumulator of partial sums:
      'fvc'     : [sum d^2]
      'fvc_age' : [sum d0^2, sum d1^2]
      'all'     : [sum d0^2, sum d1^2, sum bce_i, sum ce_i]
    """
    pid = pl.program_id(0)
    nsteps = pl.num_programs(0)

    @pl.when(pid == 0)
    def _():
        acc_ref[...] = jnp.zeros_like(acc_ref)

    x = x_ref[...].astype(jnp.float32)
    t = t_ref[...].astype(jnp.float32)

    if mode == "fvc":
        d = x - t                                   # zero-padded lanes -> 0
        contrib = jnp.sum(d * d, axis=0, keepdims=True)          # (1, TB)
    elif mode == "fvc_age":
        d = x - t
        contrib = d * d                                           # (2, TB)
    else:
        # RMSE columns 0,1
        d01 = x[0:2, :] - t[0:2, :]
        sq01 = d01 * d01                                          # (2, TB)

        # BCEWithLogits, stable form; mask padded lanes (they'd add log(2)).
        z = x[2:3, :]
        y = t[2:3, :]
        bce = jnp.maximum(z, 0.0) - z * y + jnp.log1p(jnp.exp(-jnp.abs(z)))
        lane = jax.lax.broadcasted_iota(jnp.int32, (1, tb), 1)
        valid = (pid * tb + lane) < b_true
        bce = jnp.where(valid, bce, 0.0)                          # (1, TB)

        # CrossEntropy with soft (probability) targets; classes on sublanes.
        logits = x[3:6, :]                                        # (3, TB)
        probs = t[3:6, :]
        m = jnp.max(logits, axis=0, keepdims=True)                # (1, TB)
        lse = m + jnp.log(jnp.sum(jnp.exp(logits - m), axis=0, keepdims=True))
        ce = jnp.sum(probs * (lse - logits), axis=0, keepdims=True)  # (1, TB)

        # Fuse all per-sample terms into one lane reduction.
        contrib = jnp.concatenate([sq01, bce, ce], axis=0)        # (4, TB)

    acc_ref[...] += jnp.sum(contrib, axis=-1, keepdims=True)      # (K, 1)

    @pl.when(pid == nsteps - 1)
    def _():
        a = acc_ref[...]
        if mode == "fvc":
            total = jnp.sqrt(a * (1.0 / float(b_true * f_true)))          # (1,1)
        elif mode == "fvc_age":
            total = jnp.sum(jnp.sqrt(a * (1.0 / float(b_true))),
                            axis=0, keepdims=True)                        # (1,1)
        else:
            a = a * (1.0 / float(b_true))
            row = jax.lax.broadcasted_iota(jnp.int32, a.shape, 0)
            a = jnp.where(row < 2, jnp.sqrt(a), a)   # rmse rows get sqrt
            total = jnp.sum(a, axis=0, keepdims=True)                     # (1,1)
        o_ref[...] = total


def _reference_loss(inp, tgt, multi_task: str = "all"):
    """Pure-JAX reference mirroring the PyTorch semantics."""
    x = inp.astype(jnp.float32)
    t = tgt.astype(jnp.float32)
    rmse = lambda a, b: jnp.sqrt(jnp.mean((a - b) ** 2))
    if multi_task == "fvc":
        return rmse(x, t)
    if multi_task == "fvc_age":
        return rmse(x[:, 0], t[:, 0]) + rmse(x[:, 1], t[:, 1])
    z, y = x[:, 2], t[:, 2]
    bce = jnp.mean(jnp.maximum(z, 0) - z * y + jnp.log1p(jnp.exp(-jnp.abs(z))))
    logits, probs = x[:, 3:6], t[:, 3:6]
    logp = jax.nn.log_softmax(logits, axis=-1)
    ce = jnp.mean(-jnp.sum(probs * logp, axis=-1))
    return rmse(x[:, 0], t[:, 0]) + rmse(x[:, 1], t[:, 1]) + bce + ce


def custom_loss(inp, tgt, multi_task: str = "all", *,
                tile_b: int = 16384, min_pallas_batch: int = 0):
    """Pallas TPU implementation of CustomLoss.forward.

    inp, tgt: (B, F) arrays.  F must be >= 6 for the default branch,
    >= 2 for 'fvc_age'; 'fvc' uses the whole tensor.  Returns scalar f32.

    tile_b: lanes per grid step (multiple of 128).  Sized conservatively so
    2 inputs x 2 buffers x K x tile_b x 4B stays well under v5e's 16 MiB
    scoped VMEM and v7x's smaller 64 MiB total VMEM.
    min_pallas_batch: below this batch size, fall back to plain XLA (the
    custom-call launch dominates for tiny inputs); set ~4096 in production.
    """
    assert inp.shape == tgt.shape and inp.ndim == 2
    B, F = inp.shape
    mode = multi_task if multi_task in ("fvc", "fvc_age") else "all"

    if B < min_pallas_batch:
        return _reference_loss(inp, tgt, multi_task=multi_task)

    # Keep only the columns each branch actually reads, then go lane-dense.
    if mode == "fvc":
        xs, ts = inp, tgt
    elif mode == "fvc_age":
        xs, ts = inp[:, :2], tgt[:, :2]
    else:
        xs, ts = inp[:, :6], tgt[:, :6]
    k = xs.shape[1]

    xT = xs.T                                   # (K, B) — batch on lanes
    tT = ts.T

    tb = min(int(tile_b), _round_up(B, 128))    # multiple of 128
    b_pad = _round_up(B, tb)
    if b_pad != B:
        pad = ((0, 0), (0, b_pad - B))
        xT = jnp.pad(xT, pad)                   # zero pad; masked/zero-diff in kernel
        tT = jnp.pad(tT, pad)
    nsteps = b_pad // tb

    n_acc = {"fvc": 1, "fvc_age": 2, "all": 4}[mode]
    kernel = partial(_loss_kernel, mode=mode, b_true=B, f_true=F, tb=tb)

    out = pl.pallas_call(
        kernel,
        out_shape=jax.ShapeDtypeStruct((1, 1), jnp.float32),
        grid_spec=pltpu.PrefetchScalarGridSpec(
            num_scalar_prefetch=0,
            grid=(nsteps,),
            in_specs=[
                pl.BlockSpec((k, tb), lambda i: (0, i)),
                pl.BlockSpec((k, tb), lambda i: (0, i)),
            ],
            out_specs=pl.BlockSpec((1, 1), lambda i: (0, 0)),
            scratch_shapes=[pltpu.VMEM((n_acc, 1), jnp.float32)],
        ),
        compiler_params=pltpu.CompilerParams(
            dimension_semantics=("arbitrary",),   # reduction axis
        ),
    )(xT, tT)
    return out[0, 0]


if __name__ == "__main__":
    key = jax.random.PRNGKey(0)
    B, F = 8, 6
    k1, k2, k3, k4 = jax.random.split(key, 4)

    # Predictions: arbitrary real values (regressions + logits).
    inp = jax.random.normal(k1, (B, F), dtype=jnp.float32)

    # Targets: cols 0-1 continuous, col 2 in {0,1}, cols 3:6 soft class probs.
    reg_t = jax.random.normal(k2, (B, 2), dtype=jnp.float32)
    bin_t = jax.random.bernoulli(k3, 0.5, (B, 1)).astype(jnp.float32)
    cls_t = jax.nn.softmax(jax.random.normal(k4, (B, 3), dtype=jnp.float32), axis=-1)
    tgt = jnp.concatenate([reg_t, bin_t, cls_t], axis=1)

    for mode in ("fvc", "fvc_age", "all"):
        out = custom_loss(inp, tgt, multi_task=mode)
        out = jax.block_until_ready(out)
        ref = _reference_loss(inp, tgt, multi_task=mode)
        assert math.isfinite(float(out))
        assert abs(float(out) - float(ref)) < 1e-4, (mode, float(out), float(ref))

    print("KERNEL_OK")
</pallas_src>

<mosaic_0001>
module attributes {stable_mosaic.version = 11 : i64} {
  func.func @_loss_kernel(%arg0: i32, %arg1: memref<6x128xf32, #tpu.memory_space<vmem>>, %arg2: memref<6x128xf32, #tpu.memory_space<vmem>>, %arg3: memref<1x1xf32, #tpu.memory_space<vmem>>, %arg4: memref<1x1xf32, #tpu.memory_space<vmem>>) attributes {dimension_semantics = [#tpu.dimension_semantics<arbitrary>], iteration_bounds = array<i64: 1>, scalar_prefetch = 0 : i64, scratch_operands = 1 : i64, tpu.core_type = #tpu.core_type<tc>, window_params = [{transform_indices = @transform_0, window_bounds = array<i64: 6, 128>}, {transform_indices = @transform_1, window_bounds = array<i64: 6, 128>}, {pipeline_mode = #tpu.pipeline_mode<synchronous>, transform_indices = @transform_2, window_bounds = array<i64: 1, 1>}]} {
    %c0_i32 = arith.constant 0 : i32
    %0 = arith.cmpi eq, %arg0, %c0_i32 : i32
    %1 = arith.extui %0 : i1 to i32
    %c0_i32_0 = arith.constant 0 : i32
    %2 = arith.cmpi ne, %1, %c0_i32_0 : i32
    scf.if %2 {
      %cst_11 = arith.constant 0.000000e+00 : f32
      %17 = vector.broadcast %cst_11 : f32 to vector<1x1xf32>
      %c0_12 = arith.constant 0 : index
      %c0_13 = arith.constant 0 : index
      %18 = vector.load %arg4[%c0_12, %c0_13] : memref<1x1xf32, #tpu.memory_space<vmem>>, vector<1x1xf32>
      tpu.vector_store %arg4[%c0_12, %c0_13], %17 {strides = array<i32>} : memref<1x1xf32, #tpu.memory_space<vmem>>, vector<1x1xf32>,
    } else {
    }
    %c0 = arith.constant 0 : index
    %c0_1 = arith.constant 0 : index
    %3 = vector.load %arg1[%c0, %c0_1] : memref<6x128xf32, #tpu.memory_space<vmem>>, vector<6x128xf32>
    %c0_2 = arith.constant 0 : index
    %c0_3 = arith.constant 0 : index
    %4 = vector.load %arg2[%c0_2, %c0_3] : memref<6x128xf32, #tpu.memory_space<vmem>>, vector<6x128xf32>
    %5 = arith.subf %3, %4 : vector<6x128xf32>
    %6 = arith.mulf %5, %5 : vector<6x128xf32>
    %cst = arith.constant dense<0.000000e+00> : vector<128xf32>
    %7 = vector.multi_reduction <add>, %6, %cst [0] : vector<6x128xf32> to vector<128xf32>
    %8 = vector.shape_cast %7 : vector<128xf32> to vector<1x128xf32>
    %c0_4 = arith.constant 0 : index
    %c0_5 = arith.constant 0 : index
    %9 = vector.load %arg4[%c0_4, %c0_5] : memref<1x1xf32, #tpu.memory_space<vmem>>, vector<1x1xf32>
    %cst_6 = arith.constant dense<0.000000e+00> : vector<1xf32>
    %10 = vector.multi_reduction <add>, %8, %cst_6 [1] : vector<1x128xf32> to vector<1xf32>
    %11 = vector.shape_cast %10 : vector<1xf32> to vector<1x1xf32>
    %12 = arith.addf %9, %11 : vector<1x1xf32>
    %c0_7 = arith.constant 0 : index
    %c0_8 = arith.constant 0 : index
    %13 = vector.load %arg4[%c0_7, %c0_8] : memref<1x1xf32, #tpu.memory_space<vmem>>, vector<1x1xf32>
    tpu.vector_store %arg4[%c0_7, %c0_8], %12 {strides = array<i32>} : memref<1x1xf32, #tpu.memory_space<vmem>>, vector<1x1xf32>,
    %c0_i32_9 = arith.constant 0 : i32
    %14 = arith.cmpi eq, %arg0, %c0_i32_9 : i32
    %15 = arith.extui %14 : i1 to i32
    %c0_i32_10 = arith.constant 0 : i32
    %16 = arith.cmpi ne, %15, %c0_i32_10 : i32
    scf.if %16 {
      %c0_11 = arith.constant 0 : index
      %c0_12 = arith.constant 0 : index
      %17 = vector.load %arg4[%c0_11, %c0_12] : memref<1x1xf32, #tpu.memory_space<vmem>>, vector<1x1xf32>
      %cst_13 = arith.constant 0.020833334 : f32
      %18 = vector.broadcast %cst_13 : f32 to vector<1x1xf32>
      %19 = arith.mulf %17, %18 : vector<1x1xf32>
      %20 = math.sqrt %19 : vector<1x1xf32>
      %c0_14 = arith.constant 0 : index
      %c0_15 = arith.constant 0 : index
      %21 = vector.load %arg3[%c0_14, %c0_15] : memref<1x1xf32, #tpu.memory_space<vmem>>, vector<1x1xf32>
      tpu.vector_store %arg3[%c0_14, %c0_15], %20 {strides = array<i32>} : memref<1x1xf32, #tpu.memory_space<vmem>>, vector<1x1xf32>,
    } else {
    }
    return
  }
  func.func @transform_0(%arg0: i32) -> (i32, i32) {
    %c0_i32 = arith.constant 0 : i32
    %c0_i32_0 = arith.constant 0 : i32
    return %c0_i32, %arg0 : i32, i32
  }
  func.func @transform_1(%arg0: i32) -> (i32, i32) {
    %c0_i32 = arith.constant 0 : i32
    %c0_i32_0 = arith.constant 0 : i32
    return %c0_i32, %arg0 : i32, i32
  }
  func.func @transform_2(%arg0: i32) -> (i32, i32) {
    %c0_i32 = arith.constant 0 : i32
    %c0_i32_0 = arith.constant 0 : i32
    %c0_i32_1 = arith.constant 0 : i32
    return %c0_i32, %c0_i32_0 : i32, i32
  }
}

</mosaic_0001>

<bundles_post_ra>
// kernel: tpu_custom_call.1
= control target key start
LH: loop header
LB: loop body
LE: loop exit
PB: predicated region body
PF: predicated region fallthrough
CT: control target
= control target key end

     0   :  { %7 = vsyncpa [#allocation4], 0  ;;  %s215_s0 = inlined_call_operand.hbm [shape: f32[6,128], index: 0, kind: input, shape index: {}]   ;;  %s216_s1 = inlined_call_operand.hbm [shape: f32[6,128], index: 1, kind: input, shape index: {}]   ;;  %s217_s2 = inlined_call_operand.hbm [shape: f32[1,1], index: 2, kind: output, shape index: {}]  }
   0x1   :  { %8 = vsyncpa [#allocation7], 0 }
   0x2   :  { %9 = vsyncpa [#allocation5], 0  ;;  %s15_s11 = sshll.u32 %s215_s0, 4  ;;  %s184_s12 = smov [#allocation3]   ;;  %s16_s11 = int_to_ptr.hbm [resolvable:$true] %s15_s11 }
   0x3   :  { %s17_s13 = sshll.u32 %s184_s12, 4  ;;  %s26_s16 = sshll.u32 %s216_s1, 4  ;;  %s18_s13 = int_to_ptr.vmem [resolvable:$true] %s17_s13  ;;  %s27_s16 = int_to_ptr.hbm [resolvable:$true] %s26_s16 }
   0x4   :  { %20 = dma.hbm_to_vmem [thread:$0]  %s16_s11, 128, %s18_s13, [#allocation4]  }
   0x5   :  { %s185_s17 = smov [#allocation6]  }
   0x6   :  { %s28_s18 = sshll.u32 %s185_s17, 4  ;;  %s29_s18 = int_to_ptr.vmem [resolvable:$true] %s28_s18 }
   0x7   :  { %31 = dma.hbm_to_vmem [thread:$0]  %s27_s16, 128, %s29_s18, [#allocation7]  }
   0x8   :  { %178 = dma.done.wait [#allocation4], 128  }
   0x9   :  { %179 = vsyncadd [#allocation4], 4294967168 }
   0xa   :  { %180 = dma.done.wait [#allocation7], 128  }
   0xb   :  { %181 = vsyncadd [#allocation7], 4294967168  ;;  %vm44_vm0 = vcmask 0   ;;  %v186_v0 = vmov 0.0   ;;  %v46_v1 = vld [vmem:[#allocation3] sm:$0x3f] }
   0xc   :  { %45 = vst.msk [vmem:[#allocation2] sm:$0x1] %vm44_vm0, %v186_v0  ;;  %v47_v2 = vld [vmem:[#allocation6] sm:$0x3f]  ;;  %vm50_vm1 = vcmask 1045504   ;;  %s187_s0 = smov [#allocation8]  }
   0xd   :  { %v48_v3 = vsub.f32 %v46_v1, %v47_v2  ;;  %s87_s1 = sshll.u32 %s187_s0, 4  ;;  %s89_s21 = sshll.u32 %s217_s2, 4  ;;  %s88_s1 = int_to_ptr.vmem [resolvable:$true] %s87_s1  ;;  %s90_s21 = int_to_ptr.hbm [resolvable:$true] %s89_s21 }
   0xf   :  { %v49_v4 = vmul.f32 %v48_v3, %v48_v3 }
  0x11   :  { %v51_v5 = vsel %vm50_vm1, %v49_v4, 0.0 }
  0x12   :  { %v52_v6 = vrot.slane %v51_v5, 4 }
  0x13   :  { %v58_v12 = vld [vmem:[#allocation2] sm:$0x1] }
  0x14   :  { %v53_v7 = vadd.f32 %v52_v6, %v51_v5 }
  0x16   :  { %v54_v8 = vrot.slane %v53_v7, 2 }
  0x18   :  { %v55_v9 = vadd.f32 %v54_v8, %v53_v7 }
  0x1a   :  { %v56_v10 = vrot.slane %v55_v9, 1 }
  0x1c   :  { %v57_v11 = vadd.f32 %v56_v10, %v55_v9 }
  0x1e   :  { %59 = vadd.xlane.f32.xlu0 %v57_v11 }
  0x91   :  { %v60_v13 = vpop.xlane.xlu0 %59 }
  0x92   :  { %v61_v14 = vadd.f32 %v60_v13, %v58_v12 }
  0x94   :  { %63 = vst.msk [vmem:[#allocation2] sm:$0x1] %vm44_vm0, %v61_v14 }
  0x9b   :  { %v67_v15 = vld [vmem:[#allocation2] sm:$0x1] }
  0x9c   :  { %v68_v16 = vmul.f32 0.020833334, %v67_v15 }
  0x9e   :  { %104 = vrsqrt.f32 %v68_v16  ;;  %vm76_vm2 = vcmp.eq.f32.partialorder %v68_v16, inf  ;;  %v79_v24 = vand.u32 2147483648, %v68_v16  ;;  %vm78_vm3 = vcmp.eq.f32.partialorder %v68_v16, 0.0 }
  0xa4   :  { %v105_v17 = vpop.eup %104 }
  0xa5   :  { %v70_v18 = vmul.f32 %v105_v17, %v68_v16 }
  0xa7   :  { %v71_v19 = vmul.f32 %v105_v17, %v70_v18 }
  0xa9   :  { %v72_v20 = vmul.f32 0.5, %v71_v19 }
  0xab   :  { %v73_v21 = vsub.f32 1.5, %v72_v20 }
  0xad   :  { %v74_v22 = vmul.f32 %v105_v17, %v73_v21 }
  0xaf   :  { %v75_v23 = vmul.f32 %v74_v22, %v68_v16 }
  0xb1   :  { %v77_v25 = vsel %vm76_vm2, %v68_v16, %v75_v23 }
  0xb2   :  { %v80_v26 = vsel %vm78_vm3, %v79_v24, %v77_v25 }
  0xb3   :  { %81 = vst.msk [vmem:[#allocation8] sm:$0x1] %vm44_vm0, %v80_v26 }
  0xb4   :  { %92 = dma.vmem_to_hbm [thread:$0]  %s88_s1, 16, %s90_s21, [#allocation5]  }
  0xb5   :  { %182 = dma.done.wait [#allocation5], 16  }
  0xb6   :  { %183 = vsyncadd [#allocation5], 4294967280 }
  0xb7   :  { %97 = vsyncpa [#allocation4], 1 }
  0xb8   :  { %98 = vsyncpa [#allocation7], 1 }
  0xb9   :  { %99 = vsyncpa [#allocation5], 1 }

</bundles_post_ra>
